<compile_context>
chip_gen: v5e
topology: v5e:2x2
jax: 0.10.0
libtpu: 0.0.40
codegen_flags: <defaults>
</compile_context>

<pallas_src>
import jax
import jax.numpy as jnp
from jax.experimental import pallas as pl
from jax.experimental.pallas import tpu as pltpu


def _round_up(x, m):
    return ((x + m - 1) // m) * m


def _iou_batch_kernel(c_ref, o_ref):
    # c_ref: (8, TILE_B) f32 SoA coordinates; o_ref: (1, TILE_B) f32 losses.
    c = c_ref[...]
    l1, t1, r1, b1 = c[0:1, :], c[1:2, :], c[2:3, :], c[3:4, :]
    l2, t2, r2, b2 = c[4:5, :], c[5:6, :], c[6:7, :], c[7:8, :]

    s_rect1 = (b1 - t1 + 1.0) * (r1 - l1 + 1.0)
    s_rect2 = (b2 - t2 + 1.0) * (r2 - l2 + 1.0)

    cross_left = jnp.maximum(l1, l2)
    cross_right = jnp.minimum(r1, r2)
    cross_top = jnp.maximum(t1, t2)
    cross_bottom = jnp.minimum(b1, b2)

    s_cross = (cross_right - cross_left + 1.0) * (cross_bottom - cross_top + 1.0)
    union = s_rect1 + s_rect2 - s_cross

    no_overlap = (cross_left >= cross_right) | (cross_top >= cross_bottom)
    degenerate = (union <= 0.0) | (s_cross <= 0.0)
    zero_out = no_overlap | degenerate

    # Guard div/log against the zero-output branch (and padded lanes).
    safe_cross = jnp.where(zero_out, 1.0, s_cross)
    safe_union = jnp.where(zero_out, 1.0, union)
    loss = -jnp.log(safe_cross / safe_union)

    o_ref[...] = jnp.where(zero_out, 0.0, loss)


def iou_loss_batched(rects1, rects2, *, tile_b=None):
    """IoU loss for B box pairs. rects1, rects2: (B, 4) [l, t, r, b] -> (B,) f32."""
    r1 = jnp.asarray(rects1, jnp.float32).reshape(-1, 4)
    r2 = jnp.asarray(rects2, jnp.float32).reshape(-1, 4)
    B = r1.shape[0]

    if tile_b is None:
        tile_b = min(512, _round_up(B, 128))
    assert tile_b % 128 == 0
    b_pad = _round_up(B, tile_b)

    # SoA staging: (8, B_pad) with coordinates on sublanes, pairs on lanes.
    coords = jnp.concatenate([r1.T, r2.T], axis=0)  # (8, B)
    if b_pad != B:
        coords = jnp.pad(coords, ((0, 0), (0, b_pad - B)))

    out = pl.pallas_call(
        _iou_batch_kernel,
        out_shape=jax.ShapeDtypeStruct((1, b_pad), jnp.float32),
        grid_spec=pltpu.PrefetchScalarGridSpec(
            num_scalar_prefetch=0,
            grid=(b_pad // tile_b,),
            in_specs=[pl.BlockSpec((8, tile_b), lambda i: (0, i))],
            out_specs=pl.BlockSpec((1, tile_b), lambda i: (0, i)),
        ),
        compiler_params=pltpu.CompilerParams(
            dimension_semantics=("parallel",)),
    )(coords)
    return out[0, :B]


def iou_loss(rect1, rect2):
    """Single-pair API matching IOULoss.forward. rect1, rect2: shape (4,)."""
    out = iou_loss_batched(jnp.reshape(jnp.asarray(rect1, jnp.float32), (1, 4)),
                           jnp.reshape(jnp.asarray(rect2, jnp.float32), (1, 4)))
    return out[0]


def _iou_loss_ref(rects1, rects2):
    """Pure-JAX batched reference mirroring the PyTorch control flow."""
    r1 = jnp.asarray(rects1, jnp.float32).reshape(-1, 4)
    r2 = jnp.asarray(rects2, jnp.float32).reshape(-1, 4)
    l1, t1, rt1, b1 = r1[:, 0], r1[:, 1], r1[:, 2], r1[:, 3]
    l2, t2, rt2, b2 = r2[:, 0], r2[:, 1], r2[:, 2], r2[:, 3]
    s1 = (b1 - t1 + 1.0) * (rt1 - l1 + 1.0)
    s2 = (b2 - t2 + 1.0) * (rt2 - l2 + 1.0)
    cl, cr = jnp.maximum(l1, l2), jnp.minimum(rt1, rt2)
    ct, cb = jnp.maximum(t1, t2), jnp.minimum(b1, b2)
    sc = (cr - cl + 1.0) * (cb - ct + 1.0)
    un = s1 + s2 - sc
    zero = (cl >= cr) | (ct >= cb) | (un <= 0.0) | (sc <= 0.0)
    return jnp.where(zero, 0.0,
                     -jnp.log(jnp.where(zero, 1.0, sc) / jnp.where(zero, 1.0, un)))


if __name__ == "__main__":
    key = jax.random.PRNGKey(0)
    k1, k2, k3, k4 = jax.random.split(key, 4)

    # Batch of box pairs [left, top, right, bottom]; mix of overlapping
    # and non-overlapping pairs.
    B = 1024  # 2 grid steps at TILE_B=512 (lets both v7x TCs get work)
    lt1 = jax.random.uniform(k1, (B, 2), minval=0.0, maxval=50.0)
    wh1 = jax.random.uniform(k2, (B, 2), minval=1.0, maxval=30.0)
    lt2 = jax.random.uniform(k3, (B, 2), minval=0.0, maxval=50.0)
    wh2 = jax.random.uniform(k4, (B, 2), minval=1.0, maxval=30.0)
    rects1 = jnp.concatenate([lt1, lt1 + wh1], axis=1)
    rects2 = jnp.concatenate([lt2, lt2 + wh2], axis=1)

    out = jax.block_until_ready(iou_loss_batched(rects1, rects2))
    ref = jax.block_until_ready(_iou_loss_ref(rects1, rects2))
    assert out.shape == (B,), out.shape
    assert jnp.allclose(out, ref, rtol=1e-5, atol=1e-6), (out[:8], ref[:8])

    # Single-pair path (original nn.Module API), overlapping boxes.
    loss = jax.block_until_ready(iou_loss(rects1[0], rects2[0]))
    assert jnp.allclose(loss, ref[0], rtol=1e-5, atol=1e-6), (loss, ref[0])

    # Non-overlapping (zero) branch.
    far = jnp.array([1000.0, 1000.0, 1010.0, 1010.0], jnp.float32)
    loss0 = jax.block_until_ready(iou_loss(rects1[0], far))
    assert jnp.allclose(loss0, 0.0), loss0

    print("KERNEL_OK")
</pallas_src>

<mosaic_0001>
module attributes {stable_mosaic.version = 11 : i64} {
  func.func @_iou_batch_kernel(%arg0: i32, %arg1: memref<8x512xf32, #tpu.memory_space<vmem>>, %arg2: memref<1x512xf32, #tpu.memory_space<vmem>>) attributes {dimension_semantics = [#tpu.dimension_semantics<parallel>], iteration_bounds = array<i64: 2>, scalar_prefetch = 0 : i64, scratch_operands = 0 : i64, tpu.core_type = #tpu.core_type<tc>, window_params = [{transform_indices = @transform_0, window_bounds = array<i64: 8, 512>}, {transform_indices = @transform_1, window_bounds = array<i64: 1, 512>}]} {
    %c0 = arith.constant 0 : index
    %c0_0 = arith.constant 0 : index
    %0 = vector.load %arg1[%c0, %c0_0] : memref<8x512xf32, #tpu.memory_space<vmem>>, vector<8x512xf32>
    %1 = vector.extract_strided_slice %0 {offsets = [0, 0], sizes = [1, 512], strides = [1, 1]} : vector<8x512xf32> to vector<1x512xf32>
    %2 = vector.extract_strided_slice %0 {offsets = [1, 0], sizes = [1, 512], strides = [1, 1]} : vector<8x512xf32> to vector<1x512xf32>
    %3 = vector.extract_strided_slice %0 {offsets = [2, 0], sizes = [1, 512], strides = [1, 1]} : vector<8x512xf32> to vector<1x512xf32>
    %4 = vector.extract_strided_slice %0 {offsets = [3, 0], sizes = [1, 512], strides = [1, 1]} : vector<8x512xf32> to vector<1x512xf32>
    %5 = vector.extract_strided_slice %0 {offsets = [4, 0], sizes = [1, 512], strides = [1, 1]} : vector<8x512xf32> to vector<1x512xf32>
    %6 = vector.extract_strided_slice %0 {offsets = [5, 0], sizes = [1, 512], strides = [1, 1]} : vector<8x512xf32> to vector<1x512xf32>
    %7 = vector.extract_strided_slice %0 {offsets = [6, 0], sizes = [1, 512], strides = [1, 1]} : vector<8x512xf32> to vector<1x512xf32>
    %8 = vector.extract_strided_slice %0 {offsets = [7, 0], sizes = [1, 512], strides = [1, 1]} : vector<8x512xf32> to vector<1x512xf32>
    %9 = arith.subf %4, %2 : vector<1x512xf32>
    %cst = arith.constant 1.000000e+00 : f32
    %10 = vector.broadcast %cst : f32 to vector<1x512xf32>
    %11 = arith.addf %9, %10 : vector<1x512xf32>
    %12 = arith.subf %3, %1 : vector<1x512xf32>
    %cst_1 = arith.constant 1.000000e+00 : f32
    %13 = vector.broadcast %cst_1 : f32 to vector<1x512xf32>
    %14 = arith.addf %12, %13 : vector<1x512xf32>
    %15 = arith.mulf %11, %14 : vector<1x512xf32>
    %16 = arith.subf %8, %6 : vector<1x512xf32>
    %cst_2 = arith.constant 1.000000e+00 : f32
    %17 = vector.broadcast %cst_2 : f32 to vector<1x512xf32>
    %18 = arith.addf %16, %17 : vector<1x512xf32>
    %19 = arith.subf %7, %5 : vector<1x512xf32>
    %cst_3 = arith.constant 1.000000e+00 : f32
    %20 = vector.broadcast %cst_3 : f32 to vector<1x512xf32>
    %21 = arith.addf %19, %20 : vector<1x512xf32>
    %22 = arith.mulf %18, %21 : vector<1x512xf32>
    %23 = arith.maximumf %1, %5 : vector<1x512xf32>
    %24 = arith.minimumf %3, %7 : vector<1x512xf32>
    %25 = arith.maximumf %2, %6 : vector<1x512xf32>
    %26 = arith.minimumf %4, %8 : vector<1x512xf32>
    %27 = arith.subf %24, %23 : vector<1x512xf32>
    %cst_4 = arith.constant 1.000000e+00 : f32
    %28 = vector.broadcast %cst_4 : f32 to vector<1x512xf32>
    %29 = arith.addf %27, %28 : vector<1x512xf32>
    %30 = arith.subf %26, %25 : vector<1x512xf32>
    %cst_5 = arith.constant 1.000000e+00 : f32
    %31 = vector.broadcast %cst_5 : f32 to vector<1x512xf32>
    %32 = arith.addf %30, %31 : vector<1x512xf32>
    %33 = arith.mulf %29, %32 : vector<1x512xf32>
    %34 = arith.addf %15, %22 : vector<1x512xf32>
    %35 = arith.subf %34, %33 : vector<1x512xf32>
    %36 = arith.cmpf oge, %23, %24 : vector<1x512xf32>
    %37 = arith.cmpf oge, %25, %26 : vector<1x512xf32>
    %38 = arith.ori %36, %37 : vector<1x512xi1>
    %cst_6 = arith.constant 0.000000e+00 : f32
    %39 = vector.broadcast %cst_6 : f32 to vector<1x512xf32>
    %40 = arith.cmpf ole, %35, %39 : vector<1x512xf32>
    %cst_7 = arith.constant 0.000000e+00 : f32
    %41 = vector.broadcast %cst_7 : f32 to vector<1x512xf32>
    %42 = arith.cmpf ole, %33, %41 : vector<1x512xf32>
    %43 = arith.ori %40, %42 : vector<1x512xi1>
    %44 = arith.ori %38, %43 : vector<1x512xi1>
    %cst_8 = arith.constant 1.000000e+00 : f32
    %45 = vector.broadcast %cst_8 : f32 to vector<1x512xf32>
    %46 = arith.select %44, %45, %33 : vector<1x512xi1>, vector<1x512xf32>
    %cst_9 = arith.constant 1.000000e+00 : f32
    %47 = vector.broadcast %cst_9 : f32 to vector<1x512xf32>
    %48 = arith.select %44, %47, %35 : vector<1x512xi1>, vector<1x512xf32>
    %49 = arith.divf %46, %48 : vector<1x512xf32>
    %50 = math.log %49 : vector<1x512xf32>
    %cst_10 = arith.constant 0.000000e+00 : f32
    %51 = vector.broadcast %cst_10 : f32 to vector<1x512xf32>
    %52 = arith.subf %51, %50 : vector<1x512xf32>
    %cst_11 = arith.constant 0.000000e+00 : f32
    %53 = vector.broadcast %cst_11 : f32 to vector<1x512xf32>
    %54 = arith.select %44, %53, %52 : vector<1x512xi1>, vector<1x512xf32>
    %c0_12 = arith.constant 0 : index
    %c0_13 = arith.constant 0 : index
    %55 = vector.load %arg2[%c0_12, %c0_13] : memref<1x512xf32, #tpu.memory_space<vmem>>, vector<1x512xf32>
    tpu.vector_store %arg2[%c0_12, %c0_13], %54 {strides = array<i32>} : memref<1x512xf32, #tpu.memory_space<vmem>>, vector<1x512xf32>,
    return
  }
  func.func @transform_0(%arg0: i32) -> (i32, i32) {
    %c0_i32 = arith.constant 0 : i32
    %c0_i32_0 = arith.constant 0 : i32
    return %c0_i32, %arg0 : i32, i32
  }
  func.func @transform_1(%arg0: i32) -> (i32, i32) {
    %c0_i32 = arith.constant 0 : i32
    %c0_i32_0 = arith.constant 0 : i32
    return %c0_i32, %arg0 : i32, i32
  }
}

</mosaic_0001>

<bundles_post_ra>
// kernel: tpu_custom_call.1
= control target key start
LH: loop header
LB: loop body
LE: loop exit
PB: predicated region body
PF: predicated region fallthrough
CT: control target
= control target key end

     0   :  { %6 = vsyncpa [#allocation3], 0  ;;  %s1040_s0 = inlined_call_operand.hbm [shape: f32[8,1024], index: 0, kind: input, shape index: {}]   ;;  %s1041_s1 = inlined_call_operand.hbm [shape: f32[1,1024], index: 1, kind: output, shape index: {}]  }
   0x1   :  { %8 = vsyncpa [#allocation3 + $0x1], 0 }
   0x2   :  { %9 = vsyncpa [#allocation4], 0 }
   0x3   :  { %11 = vsyncpa [#allocation4 + $0x1], 0  ;;  %s728_s6 = smov 0   ;;  %s730_s7 = smov 0  }
   0x4   :  { %s732_s8 = smov 0   ;;  %s734_s9 = smov 0  }
   0x5 LB: > { %s749_s10 = sadd.s32 4294967295, %s715_s9   ;;  %s542_s11 = sadd.s32 4294967294, %s715_s9   ;;  %s715_s9 = sphi %s734_s9, %s1100_s9   ;;  %s711_s8 = sphi %s732_s8, %s1099_s8   ;;  %s707_s7 = sphi %s730_s7, %s1098_s7   ;;  %s703_s6 = sphi %s728_s6, %s1097_s6  }
   0x6   : > { %s753_s12 = sadd.s32 1, %s715_s9   ;;  %s24_s13 = sadd.s32 1, %s711_s8 }
   0x7   : > { %s21_s14 = ssub.s32 %s715_s9, %s753_s12  ;;  %p31_p0 = scmp.ne.s32.totalorder %s711_s8, %s707_s7 }
   0x8   : > { %p22_p1 = scmp.eq.s32.totalorder %s21_s14, 0  ;;  %p32_p2 = scmp.eq.s32.totalorder %s715_s9, 0 }
   0x9   : > { %p37_p3 = scmp.ne.s32.totalorder %s707_s7, %s703_s6  ;;  %p38_p4 = scmp.eq.s32.totalorder %s749_s10, 0 }
   0xa   : > { %s765_s15 = scalar_select %p22_p1, %s711_s8, %s24_s13  }
   0xb   : > { %p767_p5 = por %p32_p2, %p31_p0  ;;  %p771_p6 = por %p38_p4, %p37_p3 }
   0xc   : > { %p61_p7 = scmp.eq.s32.totalorder %s749_s10, 1  ;;  %p67_p8 = scmp.eq.s32.totalorder %s542_s11, 1 }
   0xd   : > { %p568_p10 = scmp.lt.s32.totalorder %s715_s9, 2  ;;  %s87_s20 = sand.u32 1, %s711_s8  }
   0xe   : > { %p778_p11 = por %p61_p7, %p31_p0  ;;  %p782_p12 = por %p67_p8, %p37_p3 }
   0xf   : > { %s555_s21 = sshll.u32 %s715_s9, 5  ;;  %s545_s22 = sshll.u32 %s87_s20, 5 }
  0x10   : > { %s96_s25 = scalar_lea.hbm %s1040_s0, %s555_s21  ;;  %s91_s27 = scalar_lea.vmem [#allocation2], %s545_s22 }
  0x11   : > { %s98_s26 = sshll.u32 %s96_s25, 4  ;;  %s100_s28 = sshll.u32 %s91_s27, 4  ;;  %s99_s26 = int_to_ptr.hbm [resolvable:$true] %s98_s26  ;;  %s101_s28 = int_to_ptr.vmem [resolvable:$true] %s100_s28 }
  0x12   : > { %p793_p13 = pnand %p568_p10, %p767_p5  ;;  %p548_p0 = scmp.ge.s32.totalorder %s715_s9, 1 }
  0x13   : > { %p105_p1 = scmp.lt.s32.totalorder %s715_s9, 3  ;;  %s88_s30 = scalar_lea.sflag [#allocation3], %s87_s20 }
  0x14   : > { %s619_s2 = sshra.s32 %s99_s26, 4  ;;  %p623_p3 = pneg %p793_p13  ;;  %s620_s2 = int_to_ptr.hbm [resolvable:$true] %s619_s2 }
  0x15   : > { %s621_s3 = scalar_lea.hbm %s620_s2, 32  ;;  %s626_s11 = scalar_lea.hbm %s1040_s0, 64 }
  0x16   : > { %p622_p2 = scmp.ne.s32.totalorder %s620_s2, %s621_s3  ;;  %p627_p5 = scmp.lt.s32.totalorder %s620_s2, %s1040_s0 }
  0x17   : > { %p628_p8 = scmp.lt.s32.totalorder %s626_s11, %s621_s3 }
  0x18   : > { %p624_p4 = pnand %p623_p3, %p622_p2 }
  0x19   : > { %p629_p10 = por %p628_p8, %p627_p5 }
  0x1a   : > { %p625_p7 = pneg %p624_p4 }
  0x1c   : > { %p630_p9 = pnand %p629_p10, %p625_p7 }
  0x1e   : > { %633 = shalt.err (!%p630_p9)
}
  0x1f   : > { %563 = dma.hbm_to_vmem [thread:$0]  (!%p793_p13), %s99_s26, 512, %s101_s28, %s88_s30  }
  0x20   : > { %p106_p2 = pnand %p548_p0, %p105_p1 }
  0x21   : > { %s814_s16 = sand.u32 (!%p106_p2), 1, %s707_s7  }
  0x22   : > { %109 = sbr.rel (%p106_p2) target bundleno = 121 (0x79), region = 24  ;;  %s549_s20 = sshll.u32 (!%p106_p2), %s814_s16, 5 }
  0x23   : > { %s112_s21 = scalar_lea.sflag (!%p106_p2), [#allocation3], %s814_s16  ;;  %s115_s22 = scalar_lea.vmem (!%p106_p2), [#allocation2], %s549_s20 }
  0x27   : > { %694 = dma.done.wait (%p771_p6), %s112_s21, 512  }
  0x28   : > { %696 = vsyncadd (%p771_p6), %s112_s21, 4294966784  ;;  %v137_v0 = vld [vmem:[%s115_s22] sm:$0xff]  ;;  %v138_v1 = vld [vmem:[%s115_s22 + $0x8] sm:$0xff]  ;;  %s550_s17 = sshll.u32 %s814_s16, 2  ;;  %s552_s23 = sshll.u32 %s749_s10, 2 }
  0x29   : > { %v139_v2 = vld [vmem:[%s115_s22 + $0x10] sm:$0xff]  ;;  %v140_v3 = vld [vmem:[%s115_s22 + $0x18] sm:$0xff]  ;;  %v145_v4 = vrot.slane %v137_v0, 6  ;;  %v146_v5 = vrot.slane %v138_v1, 6  ;;  %v177_v7 = vrot.slane %v137_v0, 4  ;;  %v178_v9 = vrot.slane %v138_v1, 4  ;;  %s467_s26 = scalar_lea.hbm %s1041_s1, %s552_s23 }
  0x2a   : > { %v147_v6 = vrot.slane %v139_v2, 6  ;;  %v148_v8 = vrot.slane %v140_v3, 6  ;;  %v179_v10 = vrot.slane %v139_v2, 4  ;;  %v180_v11 = vrot.slane %v140_v3, 4  ;;  %s134_s10 = scalar_lea.vmem [#allocation5], %s550_s17  ;;  %s471_s28 = sshll.u32 %s467_s26, 4  ;;  %s472_s28 = int_to_ptr.hbm [resolvable:$true] %s471_s28 }
  0x2b   : > { %v153_v12 = vsub.f32 %v137_v0, %v145_v4  ;;  %v154_v13 = vsub.f32 %v138_v1, %v146_v5  ;;  %v185_v15 = vmax.f32 %v137_v0, %v177_v7  ;;  %v186_v17 = vmax.f32 %v138_v1, %v178_v9  ;;  %s469_s27 = sshll.u32 %s134_s10, 4  ;;  %s457_s29 = scalar_lea.sflag [#allocation4], %s814_s16  ;;  %s470_s27 = int_to_ptr.vmem [resolvable:$true] %s469_s27 }
  0x2c   : > { %v155_v14 = vsub.f32 %v139_v2, %v147_v6  ;;  %v156_v16 = vsub.f32 %v140_v3, %v148_v8  ;;  %v187_v18 = vmax.f32 %v139_v2, %v179_v10  ;;  %v188_v19 = vmax.f32 %v140_v3, %v180_v11  ;;  %s663_s30 = sshra.s32 %s472_s28, 4  ;;  %s669_s5 = scalar_lea.hbm %s1041_s1, 8  ;;  %s664_s30 = int_to_ptr.hbm [resolvable:$true] %s663_s30 }
  0x2d   : > { %v157_v20 = vadd.f32 1.0, %v153_v12  ;;  %v158_v21 = vadd.f32 1.0, %v154_v13  ;;  %v189_v23 = vmin.f32 %v137_v0, %v177_v7  ;;  %v190_v25 = vmin.f32 %v138_v1, %v178_v9  ;;  %s665_s2 = scalar_lea.hbm %s664_s30, 4  ;;  %p670_p0 = scmp.lt.s32.totalorder %s664_s30, %s1041_s1 }
  0x2e   : > { %v159_v22 = vadd.f32 1.0, %v155_v14  ;;  %v160_v24 = vadd.f32 1.0, %v156_v16  ;;  %v191_v26 = vmin.f32 %v139_v2, %v179_v10  ;;  %v192_v27 = vmin.f32 %v140_v3, %v180_v11  ;;  %p666_p6 = scmp.ne.s32.totalorder %s664_s30, %s665_s2  ;;  %p671_p1 = scmp.lt.s32.totalorder %s669_s5, %s665_s2 }
  0x2f   : > { %v165_v28 = vrot.slane %v157_v20, 7  ;;  %v166_v29 = vrot.slane %v158_v21, 7  ;;  %v197_v31 = vrot.slane %v185_v15, 6  ;;  %v198_v33 = vrot.slane %v186_v17, 6 }
  0x30   : > { %v167_v30 = vrot.slane %v159_v22, 7  ;;  %v168_v32 = vrot.slane %v160_v24, 7  ;;  %v199_v34 = vrot.slane %v187_v18, 6  ;;  %v200_v35 = vrot.slane %v188_v19, 6  ;;  %p667_p9 = pnand %p666_p6, %p778_p11  ;;  %p672_p3 = por %p671_p1, %p670_p0 }
  0x31   : > { %v173_v36 = vmul.f32 %v165_v28, %v157_v20  ;;  %v174_v37 = vmul.f32 %v166_v29, %v158_v21  ;;  %v205_v39 = vsub.f32 %v189_v23, %v197_v31  ;;  %v206_v41 = vsub.f32 %v190_v25, %v198_v33 }
  0x32   : > { %v175_v38 = vmul.f32 %v167_v30, %v159_v22  ;;  %v176_v40 = vmul.f32 %v168_v32, %v160_v24  ;;  %v207_v42 = vsub.f32 %v191_v26, %v199_v34  ;;  %v208_v43 = vsub.f32 %v192_v27, %v200_v35  ;;  %p668_p13 = pneg %p667_p9 }
  0x33   : > { %v209_v44 = vadd.f32 1.0, %v205_v39  ;;  %v233_v45 = vrot.slane %v173_v36, 4  ;;  %v234_v46 = vrot.slane %v174_v37, 4  ;;  %v210_v48 = vadd.f32 1.0, %v206_v41 }
  0x34   : > { %v235_v47 = vrot.slane %v175_v38, 4  ;;  %v211_v49 = vadd.f32 1.0, %v207_v42  ;;  %v212_v50 = vadd.f32 1.0, %v208_v43  ;;  %v236_v51 = vrot.slane %v176_v40, 4  ;;  %p673_p4 = pnand %p672_p3, %p668_p13 }
  0x35   : > { %v217_v52 = vrot.slane %v209_v44, 1  ;;  %v241_v53 = vadd.f32 %v233_v45, %v173_v36  ;;  %v242_v54 = vadd.f32 %v234_v46, %v174_v37  ;;  %v218_v56 = vrot.slane %v210_v48, 1 }
  0x36   : > { %v243_v55 = vadd.f32 %v235_v47, %v175_v38  ;;  %v219_v57 = vrot.slane %v211_v49, 1  ;;  %v220_v58 = vrot.slane %v212_v50, 1  ;;  %v244_v59 = vadd.f32 %v236_v51, %v176_v40 }
  0x37   : > { %v822_v60 = vmul.f32 %v217_v52, %v209_v44  ;;  %v265_v61 = vrot.slane %v189_v23, 2  ;;  %v266_v62 = vrot.slane %v190_v25, 2  ;;  %v267_v63 = vrot.slane %v191_v26, 2 }
  0x38   : > { %v824_v0 = vmul.f32 %v218_v56, %v210_v48  ;;  %v826_v1 = vmul.f32 %v219_v57, %v211_v49  ;;  %v828_v2 = vmul.f32 %v220_v58, %v212_v50  ;;  %v268_v3 = vrot.slane %v192_v27, 2 }
  0x39   : > { %v249_v4 = vrot.slane %v822_v60, 7  ;;  %vm831_vm0 = vcmp.ge.f32.partialorder %v185_v15, %v265_v61  ;;  %v1053_v5 = vmov 0  ;;  %vm835_vm1 = vcmp.ge.f32.partialorder %v186_v17, %v266_v62 }
  0x3a   : > { %v1054_v5 = vsel %vm831_vm0, 4294967295, %v1053_v5  ;;  %vm839_vm2 = vcmp.ge.f32.partialorder %v187_v18, %v267_v63  ;;  %v250_v8 = vrot.slane %v824_v0, 7  ;;  %v251_v9 = vrot.slane %v826_v1, 7 }
  0x3b   : > { %v252_v10 = vrot.slane %v828_v2, 7  ;;  %vm846_vm3 = vcmp.ge.f32.partialorder %v188_v19, %v268_v3  ;;  %v1059_v11 = vmov 0  ;;  %v850_v12 = vsub.f32 %v241_v53, %v249_v4 }
  0x3c   : > { %v1060_v11 = vsel %vm846_vm3, 4294967295, %v1059_v11  ;;  %v717_v13 = vmov 0   ;;  %v258_v21 = vsub.f32 %v242_v54, %v250_v8  ;;  %v259_v22 = vsub.f32 %v243_v55, %v251_v9 }
  0x3d   : > { %v277_v14 = vsel %vm831_vm0, 1, %v717_v13  ;;  %v278_v15 = vsel %vm835_vm1, 1, %v717_v13  ;;  %v279_v16 = vsel %vm839_vm2, 1, %v717_v13  ;;  %v280_v17 = vsel %vm846_vm3, 1, %v717_v13 }
  0x3e   : > { %v281_v18 = vrot.slane %v277_v14, 1  ;;  %v282_v19 = vrot.slane %v278_v15, 1  ;;  %v283_v20 = vrot.slane %v279_v16, 1  ;;  %v260_v23 = vsub.f32 %v244_v59, %v252_v10 }
  0x3f   : > { %v284_v24 = vrot.slane %v280_v17, 1  ;;  %v1061_v25 = vmov 0  ;;  %v1063_v26 = vmov 0  ;;  %v1065_v27 = vmov 0 }
  0x40   : > { %vm860_vm4 = vcmp.ne.s32.totalorder %v281_v18, 0  ;;  %vm864_vm5 = vcmp.ne.s32.totalorder %v282_v19, 0  ;;  %vm868_vm6 = vcmp.ne.s32.totalorder %v283_v20, 0  ;;  %vm297_vm8 = vcmp.le.f32.partialorder %v822_v60, 0.0 }
  0x41   : > { %v1062_v25 = vsel %vm860_vm4, 4294967295, %v1061_v25  ;;  %v1064_v26 = vsel %vm864_vm5, 4294967295, %v1063_v26  ;;  %v1066_v27 = vsel %vm868_vm6, 4294967295, %v1065_v27  ;;  %vm298_vm9 = vcmp.le.f32.partialorder %v824_v0, 0.0 }
  0x42   : > { %vm299_vm10 = vcmp.le.f32.partialorder %v826_v1, 0.0  ;;  %vm300_vm11 = vcmp.le.f32.partialorder %v828_v2, 0.0  ;;  %v301_v28 = vsel %vm297_vm8, 1, %v717_v13  ;;  %v302_v29 = vsel %vm298_vm9, 1, %v717_v13 }
  0x43   : > { %v303_v30 = vsel %vm299_vm10, 1, %v717_v13  ;;  %v304_v31 = vsel %vm300_vm11, 1, %v717_v13  ;;  %v305_v32 = vrot.slane %v301_v28, 7  ;;  %v306_v33 = vrot.slane %v302_v29, 7 }
  0x44   : > { %v307_v34 = vrot.slane %v303_v30, 7  ;;  %v308_v35 = vrot.slane %v304_v31, 7  ;;  %vm294_vm14 = vcmp.le.f32.partialorder %v258_v21, 0.0  ;;  %vm295_vm8 = vcmp.le.f32.partialorder %v259_v22, 0.0 }
  0x45   : > { %vm309_vm9 = vcmp.ne.s32.totalorder %v305_v32, 0  ;;  %vm310_vm10 = vcmp.ne.s32.totalorder %v306_v33, 0  ;;  %vm296_vm12 = vcmp.le.f32.partialorder %v260_v23, 0.0  ;;  %vm1067_vm4 = vcmp.le.f32.partialorder %v850_v12, 0.0 }
  0x46   : > { %vm311_vm11 = vcmp.ne.s32.totalorder %v307_v34, 0  ;;  %vm312_vm7 = vcmp.ne.s32.totalorder %v308_v35, 0  ;;  %vm313_vm0 = vmor %vm1067_vm4, %vm309_vm9  ;;  %vm891_vm3 = vcmp.ne.s32.totalorder %v284_v24, 0  ;;  %v349_v40 = vrot.slane %v850_v12, 3 }
  0x47   : > { %vm314_vm13 = vmor %vm294_vm14, %vm310_vm10  ;;  %v317_v37 = vsel %vm313_vm0, 1, %v717_v13  ;;  %v350_v43 = vrot.slane %v258_v21, 3  ;;  %vm1070_vm6 = vnez %v1060_v11  ;;  %v351_v46 = vrot.slane %v259_v22, 3 }
  0x48   : > { %vm315_vm5 = vmor %vm295_vm8, %vm311_vm11  ;;  %v318_v38 = vsel %vm314_vm13, 1, %v717_v13  ;;  %v321_v39 = vrot.slane %v317_v37, 3  ;;  %vm1071_vm13 = vnez %v1054_v5  ;;  %vm1072_vm14 = vnez %v1062_v25 }
  0x49   : > { %vm316_vm15 = vmor %vm296_vm12, %vm312_vm7  ;;  %v319_v41 = vsel %vm315_vm5, 1, %v717_v13  ;;  %v322_v42 = vrot.slane %v318_v38, 3  ;;  %v352_v49 = vrot.slane %v260_v23, 3  ;;  %vm1076_vm12 = vnez %v1064_v26 }
  0x4a   : > { %vm292_vm4 = vmor %vm1070_vm6, %vm891_vm3  ;;  %v320_v44 = vsel %vm316_vm15, 1, %v717_v13  ;;  %v323_v45 = vrot.slane %v319_v41, 3  ;;  %vm325_vm9 = vcmp.ne.s32.totalorder %v321_v39, 0  ;;  %v333_v57 = vrot.slane %v822_v60, 2 }
  0x4b   : > { %v324_v47 = vrot.slane %v320_v44, 3  ;;  %vm326_vm0 = vcmp.ne.s32.totalorder %v322_v42, 0  ;;  %vm1073_vm8 = vmor %vm1071_vm13, %vm1072_vm14  ;;  %v334_v58 = vrot.slane %v824_v0, 2  ;;  %v335_v63 = vrot.slane %v826_v1, 2 }
  0x4c   : > { %vm905_vm7 = vmor %vm1073_vm8, %vm325_vm9  ;;  %vm327_vm5 = vcmp.ne.s32.totalorder %v323_v45, 0  ;;  %vm1080_vm9 = vnez %v1066_v27  ;;  %v336_v3 = vrot.slane %v828_v2, 2 }
  0x4d   : > { %vm1077_vm15 = vmor %vm835_vm1, %vm1076_vm12  ;;  %v357_v51 = vsel %vm905_vm7, 1.0, %v349_v40  ;;  %vm328_vm11 = vcmp.ne.s32.totalorder %v324_v47, 0  ;;  %v341_v4 = vsel %vm905_vm7, 1.0, %v333_v57 }
  0x4e   : > { %vm914_vm10 = vmor %vm1077_vm15, %vm326_vm0  ;;  %603 = vrcp.f32 %v357_v51  ;;  %v370_v59 = vand.u32 2147483647, %v357_v51  ;;  %v372_v62 = vand.u32 2147483648, %v357_v51 }
  0x4f   : > { %vm1081_vm13 = vmor %vm839_vm2, %vm1080_vm9  ;;  %v358_v53 = vsel %vm914_vm10, 1.0, %v350_v43  ;;  %v342_v60 = vsel %vm914_vm10, 1.0, %v334_v58  ;;  %vm366_vm2 = vweird.f32 %v357_v51 }
  0x50   : > { %vm925_vm14 = vmor %vm1081_vm13, %vm327_vm5  ;;  %605 = vrcp.f32 %v358_v53  ;;  %vm955_vm3 = vcmp.eq.f32.partialorder %v370_v59, 8.507059e+37  ;;  %v387_v7 = vand.u32 2147483648, %v358_v53  ;;  %v373_v2 = vor.u32 1.1754944e-38, %v372_v62 }
  0x51   : > { %vm936_vm1 = vmor %vm292_vm4, %vm328_vm11  ;;  %v359_v55 = vsel %vm925_vm14, 1.0, %v351_v46  ;;  %vm381_vm4 = vweird.f32 %v358_v53  ;;  %v385_v10 = vand.u32 2147483647, %v358_v53  ;;  %v343_v39 = vsel %vm925_vm14, 1.0, %v335_v63 }
  0x52   : > { %v944_v56 = vsel %vm936_vm1, 1.0, %v352_v49  ;;  %607 = vrcp.f32 %v359_v55  ;;  %vm396_vm0 = vweird.f32 %v359_v55  ;;  %v400_v11 = vand.u32 2147483647, %v359_v55 }
  0x53   : > { %609 = vrcp.f32 %v944_v56  ;;  %v388_v17 = vor.u32 1.1754944e-38, %v387_v7  ;;  %v402_v18 = vand.u32 2147483648, %v359_v55  ;;  %v417_v20 = vand.u32 2147483648, %v944_v56 }
  0x54   : > { %v604_v61 = vpop.eup %603  ;;  %vm411_vm11 = vweird.f32 %v944_v56  ;;  %v415_v26 = vand.u32 2147483647, %v944_v56  ;;  %vm386_vm13 = vcmp.eq.f32.partialorder %v385_v10, 8.507059e+37  ;;  %v344_v42 = vsel %vm936_vm1, 1.0, %v336_v3 }
  0x55   : > { %v362_v5 = vmul.f32 %v604_v61, %v357_v51  ;;  %vm367_vm6 = vweird.f32 %v604_v61  ;;  %v403_v33 = vor.u32 1.1754944e-38, %v402_v18  ;;  %v418_v38 = vor.u32 1.1754944e-38, %v417_v20 }
  0x56   : > { %v606_v6 = vpop.eup %605  ;;  %vm960_vm5 = vmor %vm366_vm2, %vm367_vm6  ;;  %vm982_vm6 = vcmp.eq.f32.partialorder %v400_v11, 8.507059e+37  ;;  %v451_v7 = vlaneseq }
  0x57   : > { %v363_v8 = vsub.f32 1.0, %v362_v5  ;;  %v377_v9 = vmul.f32 %v606_v6, %v358_v53  ;;  %vm382_vm8 = vweird.f32 %v606_v6 }
  0x58   : > { %v608_v1 = vpop.eup %607  ;;  %vm967_vm15 = vmor %vm381_vm4, %vm382_vm8  ;;  %vm448_vm8 = vcmask 1041408  }
  0x59   : > { %v610_v12 = vpop.eup %609  ;;  %v364_v13 = vmul.f32 %v604_v61, %v363_v8  ;;  %v378_v14 = vsub.f32 1.0, %v377_v9  ;;  %v392_v15 = vmul.f32 %v608_v1, %v359_v55  ;;  %vm397_vm12 = vweird.f32 %v608_v1 }
  0x5a   : > { %v407_v19 = vmul.f32 %v610_v12, %v944_v56  ;;  %vm412_vm9 = vweird.f32 %v610_v12  ;;  %vm978_vm2 = vmor %vm396_vm0, %vm397_vm12  ;;  %vm444_vm0 = vcmask 1040384  }
  0x5b   : > { %v365_v21 = vadd.f32 %v604_v61, %v364_v13  ;;  %v379_v22 = vmul.f32 %v606_v6, %v378_v14  ;;  %v393_v23 = vsub.f32 1.0, %v392_v15  ;;  %vm413_vm4 = vmor %vm411_vm11, %vm412_vm9 }
  0x5c   : > { %v408_v25 = vsub.f32 1.0, %v407_v19 }
  0x5d   : > { %v369_v27 = vsel %vm960_vm5, %v604_v61, %v365_v21  ;;  %v380_v28 = vadd.f32 %v606_v6, %v379_v22  ;;  %v394_v29 = vmul.f32 %v608_v1, %v393_v23  ;;  %vm453_vm5 = vcmp.lt.s32.totalorder %v451_v7, 512 }
  0x5e   : > { %v374_v30 = vsel %vm955_vm3, %v373_v2, %v369_v27  ;;  %v409_v34 = vmul.f32 %v610_v12, %v408_v25  ;;  %vm416_vm3 = vcmp.eq.f32.partialorder %v415_v26, 8.507059e+37 }
  0x5f   : > { %v375_v35 = vmul.f32 %v374_v30, %v341_v4  ;;  %v384_v36 = vsel %vm967_vm15, %v606_v6, %v380_v28  ;;  %v395_v37 = vadd.f32 %v608_v1, %v394_v29 }
  0x60   : > { %v389_v40 = vsel %vm386_vm13, %v388_v17, %v384_v36  ;;  %v410_v41 = vadd.f32 %v610_v12, %v409_v34 }
  0x61   : > { %v390_v43 = vmul.f32 %v389_v40, %v342_v60  ;;  %v399_v44 = vsel %vm978_vm2, %v608_v1, %v395_v37  ;;  %611 = vlog2.f32 %v375_v35 }
  0x62   : > { %v404_v45 = vsel %vm982_vm6, %v403_v33, %v399_v44  ;;  %v414_v46 = vsel %vm413_vm4, %v610_v12, %v410_v41 }
  0x63   : > { %v405_v47 = vmul.f32 %v404_v45, %v343_v39  ;;  %v419_v49 = vsel %vm416_vm3, %v418_v38, %v414_v46  ;;  %613 = vlog2.f32 %v390_v43 }
  0x64   : > { %v420_v51 = vmul.f32 %v419_v49, %v344_v42 }
  0x65   : > { %615 = vlog2.f32 %v405_v47 }
  0x66   : > { %617 = vlog2.f32 %v420_v51 }
  0x67   : > { %v612_v53 = vpop.eup %611 }
  0x68   : > { %v422_v55 = vmul.f32 0.6931472, %v612_v53 }
  0x69   : > { %v614_v56 = vpop.eup %613 }
  0x6a   : > { %v424_v57 = vmul.f32 0.6931472, %v614_v56  ;;  %v429_v59 = vsub.f32 0.0, %v422_v55 }
  0x6b   : > { %v616_v58 = vpop.eup %615 }
  0x6c   : > { %v618_v61 = vpop.eup %617  ;;  %v426_v62 = vmul.f32 0.6931472, %v616_v58  ;;  %v430_v63 = vsub.f32 0.0, %v424_v57  ;;  %v433_v60 = vsel %vm905_vm7, 0.0, %v429_v59 }
  0x6d   : > { %v428_v3 = vmul.f32 0.6931472, %v618_v61 }
  0x6e   : > { %v431_v4 = vsub.f32 0.0, %v426_v62  ;;  %v434_v5 = vsel %vm914_vm10, 0.0, %v430_v63  ;;  %vm446_vm10 = vcmask 1042434  }
  0x6f   : > { %v432_v6 = vsub.f32 0.0, %v428_v3  ;;  %v441_v0 = vrot.slane %v434_v5, 7 }
  0x70   : > { %v435_v8 = vsel %vm925_vm14, 0.0, %v431_v4 }
  0x71   : > { %v436_v9 = vsel %vm936_vm1, 0.0, %v432_v6  ;;  %v442_v50 = vrot.slane %v435_v8, 6  ;;  %v445_v2 = vsel %vm444_vm0, %v433_v60, %v441_v0 }
  0x72   : > { %v443_v1 = vrot.slane %v436_v9, 5 }
  0x74   : > { %v447_v48 = vsel %vm446_vm10, %v442_v50, %v443_v1 }
  0x75   : > { %v449_v10 = vsel %vm448_vm8, %v445_v2, %v447_v48 }
  0x76   : > { %455 = vst.msk [vmem:[%s134_s10] sm:$0xf] %vm453_vm5, %v449_v10 }
  0x77   : > { %676 = shalt.err (!%p673_p4)
}
  0x78   : > { %558 = dma.vmem_to_hbm [thread:$0]  (%p778_p11), %s470_s27, 64, %s472_s28, %s457_s29  }
  0x79 PF: > { %s483_s14 = sand.u32 1, %s703_s6   ;;  %p1096_p7 = scmp.ge.s32.totalorder %s715_s9, 2 }
  0x7a   : > { %s484_s16 = scalar_lea.sflag [#allocation4], %s483_s14 }
  0x7b   : > { %p565_p5 = pnand %p1096_p7, %p782_p12 }
  0x7d   : > { %p566_p8 = pneg %p565_p5 }
  0x7f   : > { %698 = dma.done.wait (%p566_p8), %s484_s16, 64  }
  0x80   : > { %700 = vsyncadd (%p566_p8), %s484_s16, 4294967232  ;;  %p14_p10 = scmp.ge.s32.totalorder %s753_s12, 4   ;;  %s1097_s6 = smov %s707_s7 }
  0x81   : > { %s1098_s7 = smov %s711_s8  ;;  %s1099_s8 = smov %s765_s15 }
  0x82   : > { %s1100_s9 = smov %s753_s12  ;;  %16 = sbr.rel (!%p14_p10) target bundleno = 5 (0x5), region = 69 }
  0x87   :  { %490 = vsyncpa [#allocation3], 1 }
  0x88   :  { %492 = vsyncpa [#allocation3 + $0x1], 1 }
  0x89   :  { %493 = vsyncpa [#allocation4], 1 }
  0x8a   :  { %495 = vsyncpa [#allocation4 + $0x1], 1 }

</bundles_post_ra>
